<compile_context>
chip_gen: v7x
topology: tpu7x:2x2x1
jax: 0.10.0
libtpu: 0.0.40
codegen_flags: <defaults>
</compile_context>

<pallas_src>
import functools

import jax
import jax.numpy as jnp
from jax import lax
from jax.experimental import pallas as pl
from jax.experimental.pallas import tpu as pltpu

ALIGN_MARGIN = 0.5


def _cmli_fused_kernel(img_ref, tpos_ref, tneg_ref, eos_pos_ref, eos_neg_ref,
                       out_ref, *, align_margin):
    """One grid step == one image block paired with its positive text block and
    its (block-rolled) negative text block.

    img_ref:      (Bb, I, D) bf16   image tokens (CLS kept; excluded via masking)
    tpos_ref:     (Bb, T, D) bf16   positive text block
    tneg_ref:     (Bb, T, D) bf16   negative (permuted) text block
    eos_pos_ref:  (Bb, 1, 1) int32  per-row index of the last valid (EOS) token
    eos_neg_ref:  (Bb, 1, 1) int32  same, for the negative block
    out_ref:      (1, 8, 128) f32   per-core partial loss accumulator
    """
    s = pl.program_id(1)
    n_img = img_ref.shape[1]
    n_txt = tpos_ref.shape[1]
    neg_fill = jnp.finfo(jnp.float32).min

    v = img_ref[...]                                             # (Bb, I, D) bf16
    # Image inverse norms in f32 (rsqrt + eps keeps all-zero padded rows finite).
    inv_v = lax.rsqrt(
        jnp.sum(jnp.square(v.astype(jnp.float32)), axis=-1) + 1e-12)   # (Bb, I)
    inv_v = jnp.expand_dims(inv_v, 1)                            # (Bb, 1, I)

    # Image CLS column (index 0) is excluded everywhere (remove_cls equivalent).
    img_keep = lax.broadcasted_iota(jnp.int32, (1, 1, n_img), 2) >= 1   # (1,1,I)
    imgk = img_keep[:, 0, :].astype(jnp.float32)                 # (1, I)
    tok_idx = lax.broadcasted_iota(jnp.int32, (1, n_txt, 1), 1)  # (1, T, 1)

    def half_loss(t_ref, eos_ref, positive):
        t = t_ref[...]                                           # (Bb, T, D) bf16
        inv_t = lax.rsqrt(
            jnp.sum(jnp.square(t.astype(jnp.float32)), axis=-1, keepdims=True)
            + 1e-12)                                             # (Bb, T, 1)

        # raw[b, i, j] = <text_bi, image_bj>  ('b i d, b j d -> b i j'),
        # bf16 MXU inputs, f32 accumulation; normalize AFTER the matmul.
        raw = lax.dot_general(
            t, v, dimension_numbers=(((2,), (2,)), ((0,), (0,))),
            preferred_element_type=jnp.float32)                  # (Bb, T, I)
        sim = raw * inv_t * inv_v                                # (Bb, T, I) f32

        eos = eos_ref[...]                                       # (Bb, 1, 1) int32
        # Valid text tokens are 1 .. eos-1 (CLS at 0 and the EOS token excluded,
        # mirroring remove_cls + mask_eos).
        txt_keep = (tok_idx >= 1) & (tok_idx < eos)              # (Bb, T, 1)
        keep = txt_keep.astype(jnp.float32)
        cnt = jnp.maximum(eos.astype(jnp.float32)[:, :, 0] - 1.0, 1e-6)  # (Bb, 1)

        # text -> image: max over non-CLS image tokens, masked mean over valid text.
        t2i_tok = jnp.max(jnp.where(img_keep, sim, neg_fill),
                          axis=2, keepdims=True)                 # (Bb, T, 1)
        t2i = jnp.sum(t2i_tok * keep, axis=1) / cnt              # (Bb, 1)

        # image -> text: invalid text rows -> max_neg, max over text tokens,
        # mean over non-CLS image tokens.
        colmax = jnp.max(jnp.where(txt_keep, sim, neg_fill), axis=1)     # (Bb, I)
        i2t = jnp.sum(colmax * imgk, axis=1, keepdims=True) * (1.0 / (n_img - 1))

        if positive:       # target = +1  ->  1 - cos
            return jnp.sum((1.0 - i2t) + (1.0 - t2i))
        # target = -1  ->  clamp(cos - margin, 0)
        return jnp.sum(jnp.maximum(i2t - align_margin, 0.0)
                       + jnp.maximum(t2i - align_margin, 0.0))

    block_loss = (half_loss(tpos_ref, eos_pos_ref, True)
                  + half_loss(tneg_ref, eos_neg_ref, False))

    @pl.when(s == 0)
    def _():
        out_ref[...] = jnp.zeros_like(out_ref)
    out_ref[...] += block_loss


def _pick_blocks(b, n_txt, n_img, d, vmem_budget_bytes):
    """Largest bblk that (a) divides B, (b) leaves >= 2 image blocks (so the
    block-roll derangement has no fixed points), (c) fits the VMEM budget."""
    lane = 128
    d_pad = max(d, lane)
    i_pad = max(n_img, lane)
    # double-buffered bf16 inputs: image block + 2 text blocks
    in_bytes = 2 * (n_img * d_pad * 2 + 2 * n_txt * d_pad * 2)
    # f32 sim (pos + neg halves) + transient f32 upcasts for the norms
    mid_bytes = 2 * n_txt * i_pad * 4 + (n_txt + n_img) * d_pad * 4
    per_elem = in_bytes + mid_bytes + 512
    cap = max(1, vmem_budget_bytes // per_elem)
    # TODO(synk): batch sizes with no good divisor could be padded (with masked
    # dummy rows) instead of falling back to a tiny bblk.
    bblk = 1
    for cand in range(1, b // 2 + 1):
        if b % cand == 0 and cand <= cap:
            bblk = cand
    n_img_blocks = b // bblk
    n_par = 2 if n_img_blocks % 2 == 0 else 1   # give both v7x TensorCores work
    return bblk, n_par


def _cmli_pallas_loss(image, text, eos_idx, *, align_margin):
    b, n_img, d = image.shape
    _, n_txt, _ = text.shape

    try:
        vmem_cap = int(pltpu.get_tpu_info().vmem_capacity_bytes)
    except Exception:
        vmem_cap = 64 * 1024 * 1024
    bblk, n_par = _pick_blocks(b, n_txt, n_img, d, int(vmem_cap * 0.6))
    n_img_blocks = b // bblk
    n_seq = n_img_blocks // n_par

    kernel = functools.partial(_cmli_fused_kernel, align_margin=align_margin)

    def pos_idx(p, s):
        return (p * n_seq + s, 0, 0)

    def neg_idx(p, s):
        # block-roll derangement: negative text for image block g is text block
        # (g + 1) % n_img_blocks (no fixed points since n_img_blocks >= 2).
        return ((p * n_seq + s + 1) % n_img_blocks, 0, 0)

    out = pl.pallas_call(
        kernel,
        out_shape=jax.ShapeDtypeStruct((n_par, 8, 128), jnp.float32),
        grid=(n_par, n_seq),
        in_specs=[
            pl.BlockSpec((bblk, n_img, d), pos_idx),     # image (never duplicated)
            pl.BlockSpec((bblk, n_txt, d), pos_idx),     # positive text block
            pl.BlockSpec((bblk, n_txt, d), neg_idx),     # permuted-negative text block
            pl.BlockSpec((bblk, 1, 1), pos_idx),         # EOS index, positive rows
            pl.BlockSpec((bblk, 1, 1), neg_idx),         # EOS index, negative rows
        ],
        out_specs=pl.BlockSpec((1, 8, 128), lambda p, s: (p, 0, 0)),
        compiler_params=pltpu.CompilerParams(
            dimension_semantics=("parallel", "arbitrary"),
            vmem_limit_bytes=int(vmem_cap * 0.85)),
    )(image, text, text, eos_idx, eos_idx)

    # one partial sum per parallel slice, broadcast over the (8,128) tile
    return jnp.sum(out[:, 0, 0])


def cosine_cmli_loss(image_features, text_features, padding_mask,
                     align_margin=ALIGN_MARGIN):
    """JAX glue reproducing CosineCMLILoss.forward; heavy work lives in the kernel."""
    b, n_txt, d = text_features.shape
    bi, n_img, di = image_features.shape
    assert bi == b and di == d and b >= 2

    # mask_eos equivalent: index of the last valid (zero) token per row.  The
    # kernel rebuilds "valid = 1 <= t < eos" in-registers, which also folds in
    # the CLS removal on the text side.
    # TODO(synk): assumes contiguous padding masks (valid prefix then padding),
    # which is what mask_eos-based pipelines produce.
    zeros = (padding_mask == 0).astype(jnp.int32)
    eos_idx = jnp.argmax(jnp.cumsum(zeros, axis=1), axis=1).astype(jnp.int32)
    eos_idx = eos_idx.reshape(b, 1, 1)

    # to_half: reference runs the einsum in fp16; bf16 is the TPU analogue.
    # TODO(synk): torch.randperm-based derangement replaced by a deterministic
    # block-roll (still guarantees no fixed points for B >= 2).
    text_bf = text_features.astype(jnp.bfloat16)
    img_bf = image_features.astype(jnp.bfloat16)

    loss_sum = _cmli_pallas_loss(img_bf, text_bf, eos_idx,
                                 align_margin=align_margin)

    # total = (mean_2B i2t_loss + mean_2B t2i_loss) / 2 = sum(...) / (2 * 2B)
    loss = loss_sum / (2.0 * 2.0 * b)
    return {"loss": loss}


if __name__ == "__main__":
    key = jax.random.PRNGKey(0)
    k_img, k_txt = jax.random.split(key)

    B, T, I, D = 2, 8, 17, 32  # batch, text tokens (incl. CLS), image tokens (incl. CLS), dim
    image_features = jax.random.normal(k_img, (B, I, D), jnp.float32).astype(jnp.bfloat16)
    text_features = jax.random.normal(k_txt, (B, T, D), jnp.float32).astype(jnp.bfloat16)

    # padding mask convention: 0 = valid token, 1 = padding
    lengths = jnp.array([8, 5])
    padding_mask = (jnp.arange(T)[None, :] >= lengths[:, None]).astype(jnp.int32)

    out = cosine_cmli_loss(image_features, text_features, padding_mask)
    loss = jax.block_until_ready(out["loss"])
    assert bool(jnp.isfinite(loss))
    print("KERNEL_OK")
</pallas_src>

<mosaic_0001>
module attributes {stable_mosaic.version = 11 : i64} {
  func.func @_cmli_fused_kernel(%arg0: i32, %arg1: i32, %arg2: memref<1x17x32xbf16, #tpu.memory_space<vmem>>, %arg3: memref<1x8x32xbf16, #tpu.memory_space<vmem>>, %arg4: memref<1x8x32xbf16, #tpu.memory_space<vmem>>, %arg5: memref<1x1x1xi32, #tpu.memory_space<vmem>>, %arg6: memref<1x1x1xi32, #tpu.memory_space<vmem>>, %arg7: memref<1x8x128xf32, #tpu.memory_space<vmem>>) attributes {dimension_semantics = [#tpu.dimension_semantics<parallel>, #tpu.dimension_semantics<arbitrary>], iteration_bounds = array<i64: 2, 1>, scalar_prefetch = 0 : i64, scratch_operands = 0 : i64, tpu.core_type = #tpu.core_type<tc>, window_params = [{transform_indices = @transform_0, window_bounds = array<i64: 1, 17, 32>}, {transform_indices = @transform_1, window_bounds = array<i64: 1, 8, 32>}, {transform_indices = @transform_2, window_bounds = array<i64: 1, 8, 32>}, {transform_indices = @transform_3, window_bounds = array<i64: 1, 1, 1>}, {transform_indices = @transform_4, window_bounds = array<i64: 1, 1, 1>}, {transform_indices = @transform_5, window_bounds = array<i64: 1, 8, 128>}]} {
    %c0 = arith.constant 0 : index
    %c0_0 = arith.constant 0 : index
    %c0_1 = arith.constant 0 : index
    %0 = vector.load %arg2[%c0, %c0_0, %c0_1] : memref<1x17x32xbf16, #tpu.memory_space<vmem>>, vector<1x17x32xbf16>
    %1 = arith.extf %0 : vector<1x17x32xbf16> to vector<1x17x32xf32>
    %2 = arith.mulf %1, %1 : vector<1x17x32xf32>
    %cst = arith.constant dense<0.000000e+00> : vector<1x17xf32>
    %3 = vector.multi_reduction <add>, %2, %cst [2] : vector<1x17x32xf32> to vector<1x17xf32>
    %cst_2 = arith.constant 9.99999996E-13 : f32
    %4 = vector.broadcast %cst_2 : f32 to vector<1x17xf32>
    %5 = arith.addf %3, %4 : vector<1x17xf32>
    %6 = math.rsqrt %5 : vector<1x17xf32>
    %7 = vector.shape_cast %6 : vector<1x17xf32> to vector<1x1x17xf32>
    %8 = tpu.iota {dimensions = array<i32: 2>} : vector<1x1x17xi32>
    %c1_i32 = arith.constant 1 : i32
    %9 = vector.broadcast %c1_i32 : i32 to vector<1x1x17xi32>
    %10 = arith.cmpi sge, %8, %9 : vector<1x1x17xi32>
    %11 = vector.shape_cast %10 : vector<1x1x17xi1> to vector<1x17xi1>
    %12 = arith.extui %11 : vector<1x17xi1> to vector<1x17xi32>
    %13 = arith.sitofp %12 : vector<1x17xi32> to vector<1x17xf32>
    %14 = tpu.iota {dimensions = array<i32: 1>} : vector<1x8x1xi32>
    %c0_3 = arith.constant 0 : index
    %c0_4 = arith.constant 0 : index
    %c0_5 = arith.constant 0 : index
    %15 = vector.load %arg3[%c0_3, %c0_4, %c0_5] : memref<1x8x32xbf16, #tpu.memory_space<vmem>>, vector<1x8x32xbf16>
    %16 = arith.extf %15 : vector<1x8x32xbf16> to vector<1x8x32xf32>
    %17 = arith.mulf %16, %16 : vector<1x8x32xf32>
    %cst_6 = arith.constant dense<0.000000e+00> : vector<1x8xf32>
    %18 = vector.multi_reduction <add>, %17, %cst_6 [2] : vector<1x8x32xf32> to vector<1x8xf32>
    %19 = vector.shape_cast %18 : vector<1x8xf32> to vector<1x8x1xf32>
    %cst_7 = arith.constant 9.99999996E-13 : f32
    %20 = vector.broadcast %cst_7 : f32 to vector<1x8x1xf32>
    %21 = arith.addf %19, %20 : vector<1x8x1xf32>
    %22 = math.rsqrt %21 : vector<1x8x1xf32>
    %cst_8 = arith.constant dense<0.000000e+00> : vector<1x8x17xf32>
    %23 = tpu.matmul %15, %0, %cst_8 {dimension_numbers = #tpu.dot_dimension_numbers<[2], [2], [1], [1], [0, 0, 0, 1, 1, 1], [0], [0]>} : vector<1x8x32xbf16>, vector<1x17x32xbf16>, vector<1x8x17xf32> -> vector<1x8x17xf32>
    %24 = vector.broadcast %22 : vector<1x8x1xf32> to vector<1x8x17xf32>
    %25 = arith.mulf %23, %24 : vector<1x8x17xf32>
    %26 = vector.broadcast %7 : vector<1x1x17xf32> to vector<1x8x17xf32>
    %27 = arith.mulf %25, %26 : vector<1x8x17xf32>
    %c0_9 = arith.constant 0 : index
    %c0_10 = arith.constant 0 : index
    %c0_11 = arith.constant 0 : index
    %28 = vector.load %arg5[%c0_9, %c0_10, %c0_11] : memref<1x1x1xi32, #tpu.memory_space<vmem>>, vector<1x1x1xi32>
    %c1_i32_12 = arith.constant 1 : i32
    %29 = vector.broadcast %c1_i32_12 : i32 to vector<1x8x1xi32>
    %30 = arith.cmpi sge, %14, %29 : vector<1x8x1xi32>
    %31 = vector.broadcast %28 : vector<1x1x1xi32> to vector<1x8x1xi32>
    %32 = arith.cmpi slt, %14, %31 : vector<1x8x1xi32>
    %33 = arith.andi %30, %32 : vector<1x8x1xi1>
    %34 = arith.extui %33 : vector<1x8x1xi1> to vector<1x8x1xi32>
    %35 = arith.sitofp %34 : vector<1x8x1xi32> to vector<1x8x1xf32>
    %36 = arith.sitofp %28 : vector<1x1x1xi32> to vector<1x1x1xf32>
    %37 = vector.shape_cast %36 : vector<1x1x1xf32> to vector<1x1xf32>
    %cst_13 = arith.constant 1.000000e+00 : f32
    %38 = vector.broadcast %cst_13 : f32 to vector<1x1xf32>
    %39 = arith.subf %37, %38 : vector<1x1xf32>
    %cst_14 = arith.constant 9.99999997E-7 : f32
    %40 = vector.broadcast %cst_14 : f32 to vector<1x1xf32>
    %41 = arith.maximumf %39, %40 : vector<1x1xf32>
    %cst_15 = arith.constant -3.40282347E+38 : f32
    %42 = vector.shape_cast %10 : vector<1x1x17xi1> to vector<1x1x17xi1>
    %43 = vector.broadcast %42 : vector<1x1x17xi1> to vector<1x8x17xi1>
    %44 = vector.broadcast %cst_15 : f32 to vector<1x8x17xf32>
    %45 = arith.select %43, %27, %44 : vector<1x8x17xi1>, vector<1x8x17xf32>
    %cst_16 = arith.constant dense<0xFF800000> : vector<1x8xf32>
    %46 = vector.multi_reduction <maximumf>, %45, %cst_16 [2] : vector<1x8x17xf32> to vector<1x8xf32>
    %47 = vector.shape_cast %46 : vector<1x8xf32> to vector<1x8x1xf32>
    %48 = arith.mulf %47, %35 : vector<1x8x1xf32>
    %cst_17 = arith.constant dense<0.000000e+00> : vector<1x1xf32>
    %49 = vector.multi_reduction <add>, %48, %cst_17 [1] : vector<1x8x1xf32> to vector<1x1xf32>
    %50 = arith.divf %49, %41 : vector<1x1xf32>
    %cst_18 = arith.constant -3.40282347E+38 : f32
    %51 = vector.shape_cast %33 : vector<1x8x1xi1> to vector<1x8x1xi1>
    %52 = vector.broadcast %51 : vector<1x8x1xi1> to vector<1x8x17xi1>
    %53 = vector.broadcast %cst_18 : f32 to vector<1x8x17xf32>
    %54 = arith.select %52, %27, %53 : vector<1x8x17xi1>, vector<1x8x17xf32>
    %cst_19 = arith.constant dense<0xFF800000> : vector<1x17xf32>
    %55 = vector.multi_reduction <maximumf>, %54, %cst_19 [1] : vector<1x8x17xf32> to vector<1x17xf32>
    %56 = arith.mulf %55, %13 : vector<1x17xf32>
    %cst_20 = arith.constant dense<0.000000e+00> : vector<1xf32>
    %57 = vector.multi_reduction <add>, %56, %cst_20 [1] : vector<1x17xf32> to vector<1xf32>
    %58 = vector.shape_cast %57 : vector<1xf32> to vector<1x1xf32>
    %cst_21 = arith.constant 6.250000e-02 : f32
    %59 = vector.broadcast %cst_21 : f32 to vector<1x1xf32>
    %60 = arith.mulf %58, %59 : vector<1x1xf32>
    %cst_22 = arith.constant 1.000000e+00 : f32
    %61 = vector.broadcast %cst_22 : f32 to vector<1x1xf32>
    %62 = arith.subf %61, %60 : vector<1x1xf32>
    %cst_23 = arith.constant 1.000000e+00 : f32
    %63 = vector.broadcast %cst_23 : f32 to vector<1x1xf32>
    %64 = arith.subf %63, %50 : vector<1x1xf32>
    %65 = arith.addf %62, %64 : vector<1x1xf32>
    %66 = vector.shape_cast %65 : vector<1x1xf32> to vector<1x1x1xf32>
    %cst_24 = arith.constant dense<0.000000e+00> : vector<1xf32>
    %67 = vector.multi_reduction <add>, %66, %cst_24 [1, 2] : vector<1x1x1xf32> to vector<1xf32>
    %68 = vector.shape_cast %67 : vector<1xf32> to vector<1x1x1xf32>
    %69 = vector.extract %68[0, 0, 0] : f32 from vector<1x1x1xf32>
    %c0_25 = arith.constant 0 : index
    %c0_26 = arith.constant 0 : index
    %c0_27 = arith.constant 0 : index
    %70 = vector.load %arg4[%c0_25, %c0_26, %c0_27] : memref<1x8x32xbf16, #tpu.memory_space<vmem>>, vector<1x8x32xbf16>
    %71 = arith.extf %70 : vector<1x8x32xbf16> to vector<1x8x32xf32>
    %72 = arith.mulf %71, %71 : vector<1x8x32xf32>
    %cst_28 = arith.constant dense<0.000000e+00> : vector<1x8xf32>
    %73 = vector.multi_reduction <add>, %72, %cst_28 [2] : vector<1x8x32xf32> to vector<1x8xf32>
    %74 = vector.shape_cast %73 : vector<1x8xf32> to vector<1x8x1xf32>
    %cst_29 = arith.constant 9.99999996E-13 : f32
    %75 = vector.broadcast %cst_29 : f32 to vector<1x8x1xf32>
    %76 = arith.addf %74, %75 : vector<1x8x1xf32>
    %77 = math.rsqrt %76 : vector<1x8x1xf32>
    %cst_30 = arith.constant dense<0.000000e+00> : vector<1x8x17xf32>
    %78 = tpu.matmul %70, %0, %cst_30 {dimension_numbers = #tpu.dot_dimension_numbers<[2], [2], [1], [1], [0, 0, 0, 1, 1, 1], [0], [0]>} : vector<1x8x32xbf16>, vector<1x17x32xbf16>, vector<1x8x17xf32> -> vector<1x8x17xf32>
    %79 = vector.broadcast %77 : vector<1x8x1xf32> to vector<1x8x17xf32>
    %80 = arith.mulf %78, %79 : vector<1x8x17xf32>
    %81 = vector.broadcast %7 : vector<1x1x17xf32> to vector<1x8x17xf32>
    %82 = arith.mulf %80, %81 : vector<1x8x17xf32>
    %c0_31 = arith.constant 0 : index
    %c0_32 = arith.constant 0 : index
    %c0_33 = arith.constant 0 : index
    %83 = vector.load %arg6[%c0_31, %c0_32, %c0_33] : memref<1x1x1xi32, #tpu.memory_space<vmem>>, vector<1x1x1xi32>
    %c1_i32_34 = arith.constant 1 : i32
    %84 = vector.broadcast %c1_i32_34 : i32 to vector<1x8x1xi32>
    %85 = arith.cmpi sge, %14, %84 : vector<1x8x1xi32>
    %86 = vector.broadcast %83 : vector<1x1x1xi32> to vector<1x8x1xi32>
    %87 = arith.cmpi slt, %14, %86 : vector<1x8x1xi32>
    %88 = arith.andi %85, %87 : vector<1x8x1xi1>
    %89 = arith.extui %88 : vector<1x8x1xi1> to vector<1x8x1xi32>
    %90 = arith.sitofp %89 : vector<1x8x1xi32> to vector<1x8x1xf32>
    %91 = arith.sitofp %83 : vector<1x1x1xi32> to vector<1x1x1xf32>
    %92 = vector.shape_cast %91 : vector<1x1x1xf32> to vector<1x1xf32>
    %cst_35 = arith.constant 1.000000e+00 : f32
    %93 = vector.broadcast %cst_35 : f32 to vector<1x1xf32>
    %94 = arith.subf %92, %93 : vector<1x1xf32>
    %cst_36 = arith.constant 9.99999997E-7 : f32
    %95 = vector.broadcast %cst_36 : f32 to vector<1x1xf32>
    %96 = arith.maximumf %94, %95 : vector<1x1xf32>
    %cst_37 = arith.constant -3.40282347E+38 : f32
    %97 = vector.shape_cast %10 : vector<1x1x17xi1> to vector<1x1x17xi1>
    %98 = vector.broadcast %97 : vector<1x1x17xi1> to vector<1x8x17xi1>
    %99 = vector.broadcast %cst_37 : f32 to vector<1x8x17xf32>
    %100 = arith.select %98, %82, %99 : vector<1x8x17xi1>, vector<1x8x17xf32>
    %cst_38 = arith.constant dense<0xFF800000> : vector<1x8xf32>
    %101 = vector.multi_reduction <maximumf>, %100, %cst_38 [2] : vector<1x8x17xf32> to vector<1x8xf32>
    %102 = vector.shape_cast %101 : vector<1x8xf32> to vector<1x8x1xf32>
    %103 = arith.mulf %102, %90 : vector<1x8x1xf32>
    %cst_39 = arith.constant dense<0.000000e+00> : vector<1x1xf32>
    %104 = vector.multi_reduction <add>, %103, %cst_39 [1] : vector<1x8x1xf32> to vector<1x1xf32>
    %105 = arith.divf %104, %96 : vector<1x1xf32>
    %cst_40 = arith.constant -3.40282347E+38 : f32
    %106 = vector.shape_cast %88 : vector<1x8x1xi1> to vector<1x8x1xi1>
    %107 = vector.broadcast %106 : vector<1x8x1xi1> to vector<1x8x17xi1>
    %108 = vector.broadcast %cst_40 : f32 to vector<1x8x17xf32>
    %109 = arith.select %107, %82, %108 : vector<1x8x17xi1>, vector<1x8x17xf32>
    %cst_41 = arith.constant dense<0xFF800000> : vector<1x17xf32>
    %110 = vector.multi_reduction <maximumf>, %109, %cst_41 [1] : vector<1x8x17xf32> to vector<1x17xf32>
    %111 = arith.mulf %110, %13 : vector<1x17xf32>
    %cst_42 = arith.constant dense<0.000000e+00> : vector<1xf32>
    %112 = vector.multi_reduction <add>, %111, %cst_42 [1] : vector<1x17xf32> to vector<1xf32>
    %113 = vector.shape_cast %112 : vector<1xf32> to vector<1x1xf32>
    %cst_43 = arith.constant 6.250000e-02 : f32
    %114 = vector.broadcast %cst_43 : f32 to vector<1x1xf32>
    %115 = arith.mulf %113, %114 : vector<1x1xf32>
    %cst_44 = arith.constant 5.000000e-01 : f32
    %116 = vector.broadcast %cst_44 : f32 to vector<1x1xf32>
    %117 = arith.subf %115, %116 : vector<1x1xf32>
    %cst_45 = arith.constant 0.000000e+00 : f32
    %118 = vector.broadcast %cst_45 : f32 to vector<1x1xf32>
    %119 = arith.maximumf %117, %118 : vector<1x1xf32>
    %cst_46 = arith.constant 5.000000e-01 : f32
    %120 = vector.broadcast %cst_46 : f32 to vector<1x1xf32>
    %121 = arith.subf %105, %120 : vector<1x1xf32>
    %cst_47 = arith.constant 0.000000e+00 : f32
    %122 = vector.broadcast %cst_47 : f32 to vector<1x1xf32>
    %123 = arith.maximumf %121, %122 : vector<1x1xf32>
    %124 = arith.addf %119, %123 : vector<1x1xf32>
    %125 = vector.shape_cast %124 : vector<1x1xf32> to vector<1x1x1xf32>
    %cst_48 = arith.constant dense<0.000000e+00> : vector<1xf32>
    %126 = vector.multi_reduction <add>, %125, %cst_48 [1, 2] : vector<1x1x1xf32> to vector<1xf32>
    %127 = vector.shape_cast %126 : vector<1xf32> to vector<1x1x1xf32>
    %128 = vector.extract %127[0, 0, 0] : f32 from vector<1x1x1xf32>
    %129 = arith.addf %69, %128 : f32
    %c0_i32 = arith.constant 0 : i32
    %130 = arith.cmpi eq, %arg1, %c0_i32 : i32
    %131 = arith.extui %130 : i1 to i32
    %c0_i32_49 = arith.constant 0 : i32
    %132 = arith.cmpi ne, %131, %c0_i32_49 : i32
    scf.if %132 {
      %cst_56 = arith.constant 0.000000e+00 : f32
      %137 = vector.broadcast %cst_56 : f32 to vector<1x8x128xf32>
      %c0_57 = arith.constant 0 : index
      %c0_58 = arith.constant 0 : index
      %c0_59 = arith.constant 0 : index
      %138 = vector.load %arg7[%c0_57, %c0_58, %c0_59] : memref<1x8x128xf32, #tpu.memory_space<vmem>>, vector<1x8x128xf32>
      tpu.vector_store %arg7[%c0_57, %c0_58, %c0_59], %137 {strides = array<i32>} : memref<1x8x128xf32, #tpu.memory_space<vmem>>, vector<1x8x128xf32>,
    } else {
    }
    %c0_50 = arith.constant 0 : index
    %c0_51 = arith.constant 0 : index
    %c0_52 = arith.constant 0 : index
    %133 = vector.load %arg7[%c0_50, %c0_51, %c0_52] : memref<1x8x128xf32, #tpu.memory_space<vmem>>, vector<1x8x128xf32>
    %134 = vector.broadcast %129 : f32 to vector<1x8x128xf32>
    %135 = arith.addf %133, %134 : vector<1x8x128xf32>
    %c0_53 = arith.constant 0 : index
    %c0_54 = arith.constant 0 : index
    %c0_55 = arith.constant 0 : index
    %136 = vector.load %arg7[%c0_53, %c0_54, %c0_55] : memref<1x8x128xf32, #tpu.memory_space<vmem>>, vector<1x8x128xf32>
    tpu.vector_store %arg7[%c0_53, %c0_54, %c0_55], %135 {strides = array<i32>} : memref<1x8x128xf32, #tpu.memory_space<vmem>>, vector<1x8x128xf32>,
    return
  }
  func.func @transform_0(%arg0: i32, %arg1: i32) -> (i32, i32, i32) {
    %c1_i32 = arith.constant 1 : i32
    %0 = arith.muli %arg0, %c1_i32 : i32
    %1 = arith.addi %0, %arg1 : i32
    %c0_i32 = arith.constant 0 : i32
    %c0_i32_0 = arith.constant 0 : i32
    %c0_i32_1 = arith.constant 0 : i32
    return %1, %c0_i32, %c0_i32_0 : i32, i32, i32
  }
  func.func @transform_1(%arg0: i32, %arg1: i32) -> (i32, i32, i32) {
    %c1_i32 = arith.constant 1 : i32
    %0 = arith.muli %arg0, %c1_i32 : i32
    %1 = arith.addi %0, %arg1 : i32
    %c0_i32 = arith.constant 0 : i32
    %c0_i32_0 = arith.constant 0 : i32
    %c0_i32_1 = arith.constant 0 : i32
    return %1, %c0_i32, %c0_i32_0 : i32, i32, i32
  }
  func.func @transform_2(%arg0: i32, %arg1: i32) -> (i32, i32, i32) {
    %c1_i32 = arith.constant 1 : i32
    %0 = arith.muli %arg0, %c1_i32 : i32
    %1 = arith.addi %0, %arg1 : i32
    %c1_i32_0 = arith.constant 1 : i32
    %2 = arith.addi %1, %c1_i32_0 : i32
    %c2_i32 = arith.constant 2 : i32
    %c0_i32 = arith.constant 0 : i32
    %3 = arith.cmpi eq, %c2_i32, %c0_i32 : i32
    %c1_i32_1 = arith.constant 1 : i32
    %4 = arith.select %3, %c1_i32_1, %c2_i32 : i32
    %5 = arith.remsi %2, %4 : i32
    %c0_i32_2 = arith.constant 0 : i32
    %6 = arith.cmpi ne, %5, %c0_i32_2 : i32
    %c0_i32_3 = arith.constant 0 : i32
    %7 = arith.cmpi slt, %5, %c0_i32_3 : i32
    %c0_i32_4 = arith.constant 0 : i32
    %8 = arith.cmpi slt, %4, %c0_i32_4 : i32
    %9 = arith.xori %7, %8 : i1
    %10 = arith.andi %9, %6 : i1
    %11 = arith.addi %5, %4 : i32
    %12 = arith.select %10, %11, %5 : i32
    %c0_i32_5 = arith.constant 0 : i32
    %c0_i32_6 = arith.constant 0 : i32
    %c0_i32_7 = arith.constant 0 : i32
    return %12, %c0_i32_5, %c0_i32_6 : i32, i32, i32
  }
  func.func @transform_3(%arg0: i32, %arg1: i32) -> (i32, i32, i32) {
    %c1_i32 = arith.constant 1 : i32
    %0 = arith.muli %arg0, %c1_i32 : i32
    %1 = arith.addi %0, %arg1 : i32
    %c0_i32 = arith.constant 0 : i32
    %c0_i32_0 = arith.constant 0 : i32
    %c0_i32_1 = arith.constant 0 : i32
    return %1, %c0_i32, %c0_i32_0 : i32, i32, i32
  }
  func.func @transform_4(%arg0: i32, %arg1: i32) -> (i32, i32, i32) {
    %c1_i32 = arith.constant 1 : i32
    %0 = arith.muli %arg0, %c1_i32 : i32
    %1 = arith.addi %0, %arg1 : i32
    %c1_i32_0 = arith.constant 1 : i32
    %2 = arith.addi %1, %c1_i32_0 : i32
    %c2_i32 = arith.constant 2 : i32
    %c0_i32 = arith.constant 0 : i32
    %3 = arith.cmpi eq, %c2_i32, %c0_i32 : i32
    %c1_i32_1 = arith.constant 1 : i32
    %4 = arith.select %3, %c1_i32_1, %c2_i32 : i32
    %5 = arith.remsi %2, %4 : i32
    %c0_i32_2 = arith.constant 0 : i32
    %6 = arith.cmpi ne, %5, %c0_i32_2 : i32
    %c0_i32_3 = arith.constant 0 : i32
    %7 = arith.cmpi slt, %5, %c0_i32_3 : i32
    %c0_i32_4 = arith.constant 0 : i32
    %8 = arith.cmpi slt, %4, %c0_i32_4 : i32
    %9 = arith.xori %7, %8 : i1
    %10 = arith.andi %9, %6 : i1
    %11 = arith.addi %5, %4 : i32
    %12 = arith.select %10, %11, %5 : i32
    %c0_i32_5 = arith.constant 0 : i32
    %c0_i32_6 = arith.constant 0 : i32
    %c0_i32_7 = arith.constant 0 : i32
    return %12, %c0_i32_5, %c0_i32_6 : i32, i32, i32
  }
  func.func @transform_5(%arg0: i32, %arg1: i32) -> (i32, i32, i32) {
    %c0_i32 = arith.constant 0 : i32
    %c0_i32_0 = arith.constant 0 : i32
    %c0_i32_1 = arith.constant 0 : i32
    return %arg0, %c0_i32, %c0_i32_0 : i32, i32, i32
  }
}

</mosaic_0001>

<bundles_post_ra>
// kernel: tpu_custom_call.1
= control target key start
LH: loop header
LB: loop body
LE: loop exit
PB: predicated region body
PF: predicated region fallthrough
CT: control target
= control target key end

     0   :  { %10 = vsyncpa [#allocation3], 0  ;;  %s1382_s0 = inlined_call_operand.vmem [shape: bf16[2,17,32], index: 0, kind: input, shape index: {}]   ;;  %s1383_s1 = inlined_call_operand.vmem [shape: bf16[2,8,32], index: 1, kind: input, shape index: {}]   ;;  %s1384_s2 = inlined_call_operand.vmem [shape: bf16[2,8,32], index: 2, kind: input, shape index: {}]   ;;  %s1385_s3 = inlined_call_operand.vmem [shape: s32[2,1,1], index: 3, kind: input, shape index: {}]   ;;  %s1386_s4 = inlined_call_operand.vmem [shape: s32[2,1,1], index: 4, kind: input, shape index: {}]   ;;  %s1387_s5 = inlined_call_operand.hbm [shape: f32[2,8,128], index: 5, kind: output, shape index: {}]  }
   0x1   :  { %12 = vsyncpa [#allocation3 + $0x1], 0  ;;  %s1197_s18 = smov 0   ;;  %s1199_s19 = smov 0  }
   0x2   :  { %s1201_s20 = smov 0   ;;  %s1203_s21 = smov 0  }
   0x3   :  { %s1205_s22 = smov 0   ;;  %s1207_s23 = smov 0  }
   0x4 LB: > { %s937_s24 = sadd.s32 4294967295, %s1161_s23   ;;  %s938_s25 = sadd.s32 4294967294, %s1161_s23   ;;  %s1161_s23 = sphi %s1207_s23, %s18_s23   ;;  %s1157_s22 = sphi %s1205_s22, %s1398_s22   ;;  %s1153_s21 = sphi %s1203_s21, %s1397_s21   ;;  %s1149_s20 = sphi %s1201_s20, %s1396_s20   ;;  %s1145_s19 = sphi %s1199_s19, %s1395_s19   ;;  %s1141_s18 = sphi %s1197_s18, %s1394_s18  }
   0x5   : > { %s30_s26 = sadd.s32 1, %s1157_s22  ;;  %s229_s27 = sadd.s32 1, %s1149_s20 }
   0x6   : > { %p32_p0 = scmp.ge.s32.totalorder %s30_s26, 2  ;;  %p239_p1 = scmp.ne.s32.totalorder %s1149_s20, %s1145_s19 }
   0x7   : > { %p240_p2 = scmp.eq.s32.totalorder %s937_s24, 1  ;;  %p245_p3 = scmp.ne.s32.totalorder %s1145_s19, %s1141_s18 }
   0x8   : > { %s1400_s26 = smov (%p32_p0, %s30_s26), 0  ;;  %p246_p5 = scmp.eq.s32.totalorder %s938_s25, 1 }
   0x9   : > { %p1237_p4 = por %p240_p2, %p239_p1  ;;  %s226_s29 = ssub.s32 %s1157_s22, %s1400_s26 }
   0xa   : > { %p953_p6 = scmp.ge.s32.totalorder %s1161_s23, 1  ;;  %p227_p7 = scmp.eq.s32.totalorder %s226_s29, 0 }
   0xb   : > { %p1244_p8 = por %p246_p5, %p245_p3  ;;  %p360_p9 = scmp.lt.s32.totalorder %s1161_s23, 3 }
   0xc   : > { %s1250_s6 = scalar_select %p227_p7, %s1149_s20, %s229_s27  }
   0xd   : > { %p361_p10 = pnand %p953_p6, %p360_p9 }
   0xe   : > { %p434_p11 = scmp.lt.s32.totalorder (!%p361_p10), %s1153_s21, 1  ;;  %s447_s7 = sadd.s32 (!%p361_p10), 1, %s1153_s21  ;;  %v1163_v0 = vmov (!%p361_p10), 0.0   ;;  %vm1164_vm0 = vmmov (!%p361_p10), 0   ;;  %v1165_v1 = vmov (!%p361_p10), 0   ;;  %vm524_vm1 = vcmask (!%p361_p10), 261120  }
   0xf   : > { %364 = sbr.rel (%p361_p10) target bundleno = 497 (0x1f1), region = 40  ;;  %985 = vmatprep.subr.bf16.mxu0 (!%p361_p10), %v1163_v0  ;;  %993 = vmatprep.subr.bf16.mxu1 (!%p361_p10), %v1163_v0  ;;  %s449_s8 = ssub.s32 (!%p361_p10), 0, %s447_s7  ;;  %vm531_vm2 = vcmask (!%p361_p10), 253952   ;;  %v541_v19 = vlaneseq (!%p361_p10)  ;;  %vm626_vm8 = vcmask (!%p361_p10), 130112   ;;  %vm633_vm9 = vcmask (!%p361_p10), 195712  }
  0x10   : > { %989 = vmatprep.mubr.msk.bf16.mxu0 (!%p361_p10), %vm1164_vm0, %v1163_v0  ;;  %997 = vmatprep.mubr.msk.bf16.mxu1 (!%p361_p10), %vm1164_vm0, %v1163_v0  ;;  %p448_p12 = scmp.lt.s32.totalorder (!%p361_p10), %s447_s7, 0  ;;  %s957_s10 = smin.u32 (!%p361_p10), %s449_s8, %s447_s7  ;;  %vm664_vm13 = vcmask (!%p361_p10), 138240   ;;  %vm669_vm14 = vcmask (!%p361_p10), 7168  }
  0x11   : > { %1065 = vset.pattern.permute.xlu0 (!%p361_p10), %v1165_v1  ;;  %1064 = vset.pattern.permute.xlu1 (!%p361_p10), %v1165_v1  ;;  %s451_s16 = sand.u32 (!%p361_p10), 1, %s957_s10   ;;  %v547_v23 = vshrl.u32 (!%p361_p10), %v541_v19, 7  ;;  %v542_v43 = vand.u32 (!%p361_p10), 127, %v541_v19 }
  0x12   : > { %s452_s27 = ssub.s32 (!%p361_p10), 0, %s451_s16 }
  0x13   : > { %v653_v26 = vsub.s32 (!%p361_p10), 0, %v547_v23  ;;  %vm650_vm3 = vcmp.ge.s32.totalorder (!%p361_p10), %v547_v23, 1  ;;  %v621_v46 = vadd.s32 (!%p361_p10), 4294967288, %v542_v43  ;;  %v628_v47 = vadd.s32 (!%p361_p10), 4294967280, %v542_v43 }
  0x14   : > { %v619_v49 = vsub.s32 (!%p361_p10), %v542_v43, %v547_v23  ;;  %vm543_vm12 = vcmp.ge.s32.totalorder (!%p361_p10), %v542_v43, 1 }
  0x15   : > { %v624_v50 = vsub.s32 (!%p361_p10), %v621_v46, %v547_v23  ;;  %v631_v52 = vsub.s32 (!%p361_p10), %v628_v47, %v547_v23 }
  0x16   : > { %s1257_s9 = scalar_select %p434_p11, %s1153_s21, 1 }
  0x17   : > { %s1402_s27 = smov (!%p448_p12, %s452_s27), %s451_s16 }
  0x18   : > { %s1001_s11 = smul.u32 12, %s1257_s9  ;;  %s956_s12 = sshll.u32 %s1257_s9, 2 }
  0x19   : > { %s444_s15 = scalar_lea.vmem %s1383_s1, %s956_s12  ;;  %p959_p13 = scmp.lt.s32.totalorder %s1402_s27, 0 }
  0x1a   : > { %s438_s25 = scalar_lea.vmem %s1382_s0, %s1001_s11  ;;  %v548_v2 = vld [vmem:[%s444_s15] sm:$0xf]  ;;  %s458_s29 = sadd.s32 2, %s1402_s27 }
  0x1b   : > { %v515_v3 = vld [vmem:[%s438_s25] sm:$0xff]   ;;  %v549_v4 = vunpack.c.l.bf16 %v548_v2  ;;  %v517_v5 = vld [vmem:[%s438_s25 + $0x8] sm:$0x1]  ;;  %s1404_s29 = smov (!%p959_p13, %s458_s29), %s1402_s27  ;;  %s481_s17 = scalar_lea.vmem %s1385_s3, %s1257_s9 }
  0x1c   : > { %v518_v6 = vunpack.c.l.bf16 %v515_v3  ;;  %v520_v8 = vunpack.c.l.bf16 %v517_v5  ;;  %v568_v9 = vsel %vm524_vm1, %v515_v3, 0  ;;  %v519_v11 = vunpack.c.h.bf16 %v515_v3  ;;  %p460_p0 = scmp.lt.s32.totalorder %s1404_s29, 1  ;;  %v1294_v28 = vld [vmem:[%s481_s17] sm:$0x1]  ;;  %s430_s9 = sand.u32 1, %s1145_s19  }
  0x1d   : > { %v550_v7 = vmul.f32 %v549_v4, %v549_v4  ;;  %986 = vmatpush3.bf16.xpose.msra.mxu0 %v568_v9  ;;  %994 = vmatpush3.bf16.xpose.msra.mxu1 %v568_v9  ;;  %v966_v14 = vcombine.low %v517_v5, %v517_v5  ;;  %v654_v30 = vrot.slane %v1294_v28, %v653_v26  ;;  %s954_s24 = sshll.u32 %s430_s9, 3 }
  0x1e   : > { %v521_v10 = vmul.f32 %v518_v6, %v518_v6  ;;  %v523_v13 = vmul.f32 %v520_v8, %v520_v8  ;;  %987 = vmatprep.subr.bf16.mxu0 %v1163_v0  ;;  %995 = vmatprep.subr.bf16.mxu1 %v1163_v0  ;;  %v522_v17 = vmul.f32 %v519_v11, %v519_v11  ;;  %s1406_s29 = smov (!%p460_p0, %s1404_s29), 1  ;;  %s432_s8 = scalar_lea.vmem [#allocation2], %s954_s24 }
  0x1f   : > { %v551_v12 = vsel %vm524_vm1, %v550_v7, 0.0  ;;  %v571_v18 = vsel %vm524_vm1, %v966_v14, 0  ;;  %s960_s7 = sshll.u32 %s1406_s29, 2  ;;  %s499_s14 = scalar_lea.vmem %s1386_s4, %s1406_s29  ;;  %vm655_vm5 = vcmp.lt.s32.totalorder %v547_v23, %v654_v30 }
  0x20   : > { %552 = vadd.xlane.f32.xlu0 %v551_v12  ;;  %v532_v15 = vsel %vm531_vm2, %v523_v13, 0.0  ;;  %v525_v16 = vsel %vm524_vm1, %v521_v10, 0.0  ;;  %s463_s11 = scalar_lea.vmem %s1384_s2, %s960_s7  ;;  %v528_v20 = vsel %vm524_vm1, %v522_v17, 0.0  ;;  %v1292_v27 = vld [vmem:[%s499_s14] sm:$0x1]  ;;  %vm1302_vm7 = vmand %vm650_vm3, %vm655_vm5  ;;  %s976_s29 = sshll.u32 %s1153_s21, 7 }
  0x21   : > { %533 = vadd.xlane.f32.xlu1 %v532_v15  ;;  %v701_v21 = vld [vmem:[%s463_s11] sm:$0xf]  ;;  %v758_v29 = vrot.slane %v1292_v27, %v653_v26  ;;  %v657_v34 = vsel %vm1302_vm7, 1, %v1165_v1  ;;  %v968_v47 = vsel %vm1302_vm7, 1.0, %v1163_v0  ;;  %s828_s10 = sshll.u32 %s432_s8, 4  ;;  %s1335_s13 = scalar_lea.hbm %s1387_s5, %s976_s29  ;;  %s1337_s10 = int_to_ptr.vmem [resolvable:$true] %s828_s10 }
  0x22   : > { %v702_v22 = vunpack.c.l.bf16 %v701_v21  ;;  %s815_s14 = scalar_lea.sflag [#allocation3], %s430_s9  ;;  %s1083_s15 = scalar_lea.vmem %s1337_s10, 128 }
  0x23   : > { %vm759_vm4 = vcmp.lt.s32.totalorder %v547_v23, %v758_v29  ;;  %p1084_p1 = scmp.ne.s32.totalorder %s1337_s10, %s1083_s15  ;;  %s1166_s21 = smov [#allocation2]  }
  0x24   : > { %526 = vadd.xlane.f32.xlu0 %v525_v16  ;;  %v703_v24 = vmul.f32 %v702_v22, %v702_v22  ;;  %vm1298_vm6 = vmand %vm650_vm3, %vm759_vm4  ;;  %s1087_s16 = sshll.u32 %s1166_s21, 4  ;;  %s1088_s16 = int_to_ptr.vmem [resolvable:$false] %s1087_s16 }
  0x25   : > { %988 = vmatpush3.bf16.xpose.msra.mxu0 %v571_v18  ;;  %996 = vmatpush3.bf16.xpose.msra.mxu1 %v571_v18  ;;  %v761_v33 = vsel %vm1298_vm6, 1, %v1165_v1  ;;  %v971_v43 = vsel %vm1298_vm6, 1.0, %v1163_v0  ;;  %p1085_p2 = pnand %p1084_p1, %p1237_p4  ;;  %s1089_s17 = scalar_lea.vmem %s1088_s16, 256 }
  0x26   : > { %v704_v25 = vsel %vm524_vm1, %v703_v24, 0.0  ;;  %p1090_p5 = scmp.lt.s32.totalorder %s1337_s10, %s1088_s16  ;;  %p1091_p6 = scmp.lt.s32.totalorder %s1089_s17, %s1083_s15 }
  0x27   : > { %705 = vadd.xlane.f32.xlu1 %v704_v25  ;;  %p1086_p3 = pneg %p1085_p2 }
  0x28   : > { %529 = vadd.xlane.f32.xlu0 %v528_v20  ;;  %p1092_p7 = por %p1091_p6, %p1090_p5 }
  0x2a   : > { %p1093_p9 = pnand %p1092_p7, %p1086_p3 }
  0x2c   : > { %990 = vmatmul.mubr.msk.bf16.vlgmr.msra.gmra.mrb[0].mxu0 %vm524_vm1, %v548_v2  ;;  %998 = vmatmul.mubr.msk.bf16.vlgmr.msra.gmra.mrb[0].mxu1 %vm524_vm1, %v701_v21 }
  0x38   : > { %781 = vperm.xlu1 %1064, %v761_v33  }
  0x3e   : > { %680 = vperm.xlu0 %1065, %v657_v34   ;;  %v964_v34 = vsel %vm543_vm12, 1.0, %v1163_v0 }
  0xad   : > { %v553_v35 = vpop.xlane.xlu0 %552 }
  0xae   : > { %v534_v38 = vpop.xlane.xlu1 %533  ;;  %v554_v45 = vadd.f32 1e-12, %v553_v35 }
  0xaf   : > { %v537_v41 = vadd.f32 1e-12, %v534_v38 }
  0xb1   : > { %v527_v36 = vpop.xlane.xlu0 %526 }
  0xb2   : > { %v535_v39 = vadd.f32 1e-12, %v527_v36 }
  0xb4   : > { %1069 = vrsqrt.f32 %v535_v39  ;;  %v706_v42 = vpop.xlane.xlu1 %705 }
  0xb5   : > { %v530_v37 = vpop.xlane.xlu0 %529  ;;  %v707_v44 = vadd.f32 1e-12, %v706_v42  ;;  %v659_v42 = vcvt.s32.f32 %v1294_v28 }
  0xb6   : > { %v536_v40 = vadd.f32 1e-12, %v530_v37 }
  0xb8   : > { %1071 = vrsqrt.f32 %v536_v40  ;;  %v782_v59 = vpop.permute.xlu1 %781 }
  0xb9   : > { %1073 = vrsqrt.f32 %v537_v41  ;;  %vm783_vm10 = vcmp.eq.s32.totalorder %v782_v59, 1  ;;  %v763_v41 = vcvt.s32.f32 %v1292_v27 }
  0xba   : > { %1075 = vrsqrt.f32 %v707_v44 }
  0xbb   : > { %1077 = vrsqrt.f32 %v554_v45  ;;  %v972_v44 = vadd.f32 -1.0, %v763_v41  ;;  %v969_v45 = vadd.f32 -1.0, %v659_v42 }
  0xbd   : > { %v681_v60 = vpop.permute.xlu0 %680  ;;  %v765_v46 = vmax.f32 %v972_v44, 1e-06 }
  0xbe   : > { %v1070_v48 = vpop.eup %1069  ;;  %vm682_vm11 = vcmp.eq.s32.totalorder %v681_v60, 1 }
  0xbf   : > { %v620_v54 = vrot.slane %v1070_v48, %v619_v49  ;;  %v661_v49 = vmax.f32 %v969_v45, 1e-06  ;;  %1079 = vrcp.f32 %v765_v46 }
  0xc1   : > { %1081 = vrcp.f32 %v661_v49 }
  0xc2   : > { %v1072_v51 = vpop.eup %1071 }
  0xc3   : > { %v1074_v53 = vpop.eup %1073  ;;  %v625_v55 = vrot.slane %v1072_v51, %v624_v50 }
  0xc4   : > { %v1076_v56 = vpop.eup %1075  ;;  %v632_v57 = vrot.slane %v1074_v53, %v631_v52 }
  0xc5   : > { %v627_v58 = vsel %vm626_vm8, %v625_v55, %v620_v54  ;;  %v1078_v61 = vpop.eup %1077 }
  0xc6   : > { %v634_v5 = vsel %vm633_vm9, %v632_v57, %v627_v58 }
  0xc9   : > { %v1080_v0 = vpop.eup %1079 }
  0xff   : > { %v607_v62 = vpop.f32.mrb[0].mxu0  ;;  %v746_v63 = vpop.f32.mrb[0].mxu1 }
 0x100   : > { %v613_v1 = vmul.f32 %v1078_v61, %v607_v62  ;;  %v752_v2 = vmul.f32 %v1076_v56, %v746_v63  ;;  %v999_v3 = vpop.f32.mrb[1].mxu1  ;;  %v991_v4 = vpop.f32.mrb[1].mxu0 }
 0x101   : > { %v749_v6 = vpop.f32.mrb[2].mxu1  ;;  %v610_v7 = vpop.f32.mrb[2].mxu0 }
 0x102   : > { %v648_v8 = vmul.f32 %v634_v5, %v613_v1  ;;  %v753_v9 = vmul.f32 %v752_v2, %v634_v5  ;;  %v1000_v10 = vpop.f32.mrb[3].mxu1  ;;  %v992_v11 = vpop.f32.mrb[3].mxu0 }
 0x103   : > { %v1082_v62 = vpop.eup %1081 }
 0x104   : > { %v784_v12 = vsel %vm783_vm10, %v753_v9, -3.4028235e+38  ;;  %v683_v13 = vsel %vm682_vm11, %v648_v8, -3.4028235e+38  ;;  %v766_v14 = vsel %vm543_vm12, %v753_v9, -3.4028235e+38 }
 0x105   : > { %v785_v15 = vsel %vm664_vm13, %v784_v12, -inf  ;;  %v684_v16 = vsel %vm664_vm13, %v683_v13, -inf  ;;  %v767_v17 = vsel %vm664_vm13, %v766_v14, -inf  ;;  %v663_v18 = vsel %vm543_vm12, %v648_v8, -3.4028235e+38 }
 0x106   : > { %v786_v19 = vrot.slane %v785_v15, 4  ;;  %v685_v20 = vrot.slane %v684_v16, 4  ;;  %768 = vmax.xlane.f32.xlu1 %v767_v17  ;;  %v665_v21 = vsel %vm664_vm13, %v663_v18, -inf }
 0x107   : > { %666 = vmax.xlane.f32.xlu0 %v665_v21 }
 0x108   : > { %v787_v22 = vmax.f32 %v785_v15, %v786_v19  ;;  %v686_v23 = vmax.f32 %v684_v16, %v685_v20 }
 0x10a   : > { %v788_v24 = vrot.slane %v787_v22, 2  ;;  %v687_v25 = vrot.slane %v686_v23, 2 }
 0x10c   : > { %v789_v26 = vmax.f32 %v787_v22, %v788_v24  ;;  %v688_v29 = vmax.f32 %v686_v23, %v687_v25 }
 0x10e   : > { %v790_v30 = vrot.slane %v789_v26, 1  ;;  %v689_v33 = vrot.slane %v688_v29, 1 }
 0x110   : > { %v791_v35 = vmax.f32 %v789_v26, %v790_v30  ;;  %v690_v36 = vmax.f32 %v688_v29, %v689_v33 }
 0x112   : > { %v792_v37 = vmul.f32 %v964_v34, %v791_v35  ;;  %v691_v38 = vmul.f32 %v964_v34, %v690_v36 }
 0x114   : > { %v793_v39 = vsel %vm664_vm13, %v792_v37, 0.0  ;;  %v692_v40 = vsel %vm664_vm13, %v691_v38, 0.0 }
 0x115   : > { %794 = vadd.xlane.f32.xlu1 %v793_v39 }
 0x119   : > { %693 = vadd.xlane.f32.xlu1 %v692_v40 }
 0x193   : > { %v769_v48 = vpop.xlane.xlu1 %768 }
 0x194   : > { %v770_v50 = vmul.f32 %v971_v43, %v769_v48  ;;  %v667_v51 = vpop.xlane.xlu0 %666 }
 0x195   : > { %v668_v52 = vmul.f32 %v968_v47, %v667_v51 }
 0x196   : > { %v771_v27 = vsel %vm669_vm14, %v770_v50, 0.0 }
 0x197   : > { %v772_v28 = vrot.slane %v771_v27, 4  ;;  %v670_v53 = vsel %vm669_vm14, %v668_v52, 0.0 }
 0x198   : > { %v671_v54 = vrot.slane %v670_v53, 4 }
 0x199   : > { %v773_v55 = vadd.f32 %v772_v28, %v771_v27 }
 0x19a   : > { %v672_v31 = vadd.f32 %v671_v54, %v670_v53 }
 0x19b   : > { %v774_v56 = vrot.slane %v773_v55, 2 }
 0x19c   : > { %v673_v57 = vrot.slane %v672_v31, 2 }
 0x19d   : > { %v775_v58 = vadd.f32 %v774_v56, %v773_v55 }
 0x19e   : > { %v674_v59 = vadd.f32 %v673_v57, %v672_v31 }
 0x19f   : > { %v776_v32 = vrot.slane %v775_v58, 1 }
 0x1a0   : > { %v675_v60 = vrot.slane %v674_v59, 1 }
 0x1a1   : > { %v777_v61 = vadd.f32 %v776_v32, %v775_v58 }
 0x1a2   : > { %v795_v63 = vpop.xlane.xlu1 %794  ;;  %v676_v1 = vadd.f32 %v675_v60, %v674_v59 }
 0x1a3   : > { %v796_v2 = vmul.f32 0.0625, %v795_v63  ;;  %v779_v3 = vmul.f32 %v1080_v0, %v777_v61 }
 0x1a4   : > { %v678_v5 = vmul.f32 %v1082_v62, %v676_v1 }
 0x1a5   : > { %v973_v4 = vadd.f32 -0.5, %v796_v2  ;;  %v974_v6 = vadd.f32 -0.5, %v779_v3 }
 0x1a6   : > { %v694_v7 = vpop.xlane.xlu1 %693  ;;  %v697_v12 = vsub.f32 1.0, %v678_v5 }
 0x1a7   : > { %v695_v8 = vmul.f32 0.0625, %v694_v7  ;;  %v798_v9 = vmax.f32 %v973_v4, 0.0  ;;  %v800_v10 = vmax.f32 %v974_v6, 0.0 }
 0x1a9   : > { %v696_v11 = vsub.f32 1.0, %v695_v8  ;;  %v801_v14 = vadd.f32 %v800_v10, %v798_v9 }
 0x1ab   : > { %v698_v13 = vadd.f32 %v697_v12, %v696_v11 }
 0x1ad   : > { %1002 = vpush %v698_v13 }
 0x1ae   : > { %1004 = vpush %v801_v14 }
 0x1de   : > { %s1003_s25 = spop %1002 }
 0x1df   : > { %s1005_s27 = spop %1004 }
 0x1e0   : > { %s804_s7 = sadd.f32 %s1005_s27, %s1003_s25 }
 0x1e2   : > { %v811_v15 = vstv %s804_s7 }
 0x1e3   : > { %813 = vst [vmem:[%s432_s8] sm:$0xff] %v811_v15 }
 0x1e4   : > { %1096 = shalt.err (!%p1093_p9)
}
 0x1e5   : > { %s1097_s9 = scalar_lea.hbm %s1335_s13, 128  ;;  %s1101_s27 = scalar_lea.hbm %s1387_s5, 256 }
 0x1e6   : > { %p1098_p10 = scmp.ne.s32.totalorder %s1335_s13, %s1097_s9  ;;  %p1102_p13 = scmp.lt.u32.totalorder %s1335_s13, %s1387_s5 }
 0x1e7   : > { %p1103_p0 = scmp.lt.u32.totalorder %s1101_s27, %s1097_s9  ;;  %p1105_p2 = scmp.lt.u32.totalorder %s1097_s9, %s1335_s13 }
 0x1e8   : > { %p1099_p11 = pnand %p1098_p10, %p1237_p4 }
 0x1e9   : > { %p1104_p1 = por %p1103_p0, %p1102_p13 }
 0x1ea   : > { %p1100_p12 = pneg %p1099_p11 }
 0x1eb   : > { %p1106_p3 = por %p1105_p2, %p1104_p1 }
 0x1ed   : > { %p1107_p5 = pnand %p1106_p3, %p1100_p12 }
 0x1ef   : > { %1110 = shalt.err (!%p1107_p5)
}
 0x1f0   : > { %1006 = dma.vmem_to_hbm [thread:$0]  (%p1237_p4), %s1337_s10, 128, %s1335_s13, %s815_s14  }
 0x1f1 PF: > { %p1012_p6 = scmp.ge.s32.totalorder %s1161_s23, 2  ;;  %s840_s8 = sand.u32 1, %s1141_s18  }
 0x1f2   : > { %s841_s11 = scalar_lea.sflag [#allocation3], %s840_s8 }
 0x1f3   : > { %p1009_p7 = pnand %p1012_p6, %p1244_p8 }
 0x1f5   : > { %1136 = dma.done.wait (!%p1009_p7), %s841_s11, 128  }
 0x1f6   : > { %1138 = vsyncadd (!%p1009_p7), %s841_s11, 4294967168  ;;  %s18_s23 = sadd.s32 1, %s1161_s23   ;;  %s1394_s18 = smov %s1145_s19 }
 0x1f7   : > { %p15_p9 = scmp.ge.s32.totalorder %s18_s23, 4   ;;  %s1395_s19 = smov %s1149_s20 }
 0x1f8   : > { %s1396_s20 = smov %s1250_s6  ;;  %s1397_s21 = smov %s1157_s22 }
 0x1f9   : > { %s1398_s22 = smov %s1400_s26  ;;  %17 = sbr.rel (!%p15_p9) target bundleno = 4 (0x4), region = 91 }
 0x200   :  { %846 = vsyncpa [#allocation3], 1 }
 0x201   :  { %848 = vsyncpa [#allocation3 + $0x1], 1 }

</bundles_post_ra>
